<compile_context>
chip_gen: v6e
topology: v6e:2x2x1
jax: 0.10.0
libtpu: 0.0.40
codegen_flags: <defaults>
</compile_context>

<pallas_src>
import functools

import jax
import jax.numpy as jnp
from jax import lax
from jax.experimental import pallas as pl
from jax.experimental.pallas import tpu as pltpu


def _resampler_kernel(sm_ref, x_ref, pw_ref, pb_ref, o_ref, mixed_ref, *,
                      t_chunk, n_chunks):
    # sm_ref   : (T, D_in)        softmax(weight, axis=0), f32 (resident)
    # x_ref    : (b_blk, T, D_in) batch block of tokens
    # pw_ref   : (D_in, d_blk)    pre-transposed projection-weight tile
    # pb_ref   : (1, d_blk)       projection-bias tile
    # o_ref    : (b_blk, d_blk)   output tile
    # mixed_ref: (b_blk, D_in)    f32 scratch: softmax-pooled features

    # Pooled features depend only on the batch block -> compute them once per
    # batch block (the D_out-tile axis is the inner, sequential grid axis) and
    # reuse them for every projection-weight tile.
    @pl.when(pl.program_id(1) == 0)
    def _():
        if n_chunks == 1:
            sm = sm_ref[...]                                    # (T, D_in) f32
            x = x_ref[...].astype(jnp.float32)                  # (b_blk, T, D_in)
            mixed_ref[...] = jnp.sum(sm[None] * x, axis=1)
        else:
            # T-chunked accumulation: keeps the live f32 temporary at
            # (b_blk, t_chunk, D_in) instead of (b_blk, T, D_in).
            mixed_ref[...] = jnp.zeros_like(mixed_ref)

            def body(c, carry):
                t0 = pl.multiple_of(c * t_chunk, t_chunk)
                sm_c = sm_ref[pl.ds(t0, t_chunk), :]            # (t_chunk, D_in)
                x_c = x_ref[:, pl.ds(t0, t_chunk), :].astype(jnp.float32)
                mixed_ref[...] += jnp.sum(sm_c[None] * x_c, axis=1)
                return carry

            lax.fori_loop(0, n_chunks, body, 0, unroll=n_chunks <= 8)

    # Projection: (b_blk, D_in) @ (D_in, d_blk) on the MXU, f32 accumulation.
    # Operands stay in the weight's native dtype (bf16 stays bf16).
    mixed = mixed_ref[...].astype(pw_ref.dtype)
    out = jnp.dot(mixed, pw_ref[...], preferred_element_type=jnp.float32)
    out = out + pb_ref[...].astype(jnp.float32)
    o_ref[...] = out.astype(o_ref.dtype)


def _largest_divisor_leq(n, cap):
    cap = max(1, min(int(cap), n))
    for c in range(cap, 0, -1):
        if n % c == 0:
            return c
    return 1


def conv1d_resampler(x, weight, proj_w, proj_b):
    """x: (B, T, D_in); weight: (T, D_in); proj_w: (D_out, D_in); proj_b: (D_out,)."""
    B, T, D_in = x.shape
    D_out = proj_w.shape[0]

    # Parameter-only preprocessing, hoisted out of the grid entirely.
    sm = jax.nn.softmax(weight.astype(jnp.float32), axis=0)    # (T, D_in) f32
    pw_t = proj_w.T                                            # (D_in, D_out), one-time HBM transpose
    pb = proj_b.reshape(1, D_out)

    # ---- generation-aware VMEM budget --------------------------------------
    hw_cap = 128 * 1024 * 1024
    try:
        hw_cap = int(getattr(pltpu.get_tpu_info(), "vmem_capacity_bytes", hw_cap))
    except Exception:
        pass
    kind = ""
    try:
        kind = jax.devices()[0].device_kind.lower()
    except Exception:
        pass
    is_v7x = ("v7" in kind) or (hw_cap <= 64 * 1024 * 1024)
    if is_v7x:
        # 64 MiB part: leave Mosaic internal-scratch headroom.
        budget = max(min(hw_cap, 64 * 1024 * 1024) - 12 * 1024 * 1024,
                     32 * 1024 * 1024)
    else:
        # 128 MiB parts (v5e/v6e).
        budget = min(hw_cap - 24 * 1024 * 1024, 110 * 1024 * 1024)

    x_item = x.dtype.itemsize
    w_item = pw_t.dtype.itemsize
    b_item = pb.dtype.itemsize
    o_item = x.dtype.itemsize

    def pick_t_chunk(b_blk):
        # Keep the pooling temporaries (x chunk upcast to f32 + product) small.
        tmp_budget = min(2 * 1024 * 1024, budget // 8)
        cap = max(1, tmp_budget // (2 * b_blk * D_in * 4))
        return _largest_divisor_leq(T, cap)

    def footprint(b_blk, d_blk, t_chunk):
        sm_b = 2 * T * D_in * 4                        # resident softmaxed mix weights
        x_b = 2 * b_blk * T * D_in * x_item            # double-buffered x block
        w_b = 2 * D_in * d_blk * w_item                # double-buffered weight tile
        bias_b = 2 * 8 * d_blk * b_item                # bias tile (sublane-padded)
        out_b = 2 * b_blk * d_blk * o_item             # double-buffered output tile
        pool_b = b_blk * D_in * 4                      # pooled-feature scratch
        tmp_b = 2 * b_blk * t_chunk * D_in * 4         # pooling temporaries (budgeted)
        return sm_b + x_b + w_b + bias_b + out_b + pool_b + tmp_b

    # ---- candidate tiles -----------------------------------------------------
    # b_blk: multiple of 8 or the full batch (output block (8,128) rule).
    if B <= 8:
        b_cands = [B]
    else:
        cands = {B}
        for v in (512, 256, 128, 64, 32, 16, 8):
            if v < B:
                cands.add(v)
        if is_v7x and B >= 16:
            # v7x has 2 TensorCores: guarantee >= 2 "parallel" batch blocks.
            half = ((B + 1) // 2 + 7) // 8 * 8
            cands = {c for c in cands if c <= half}
            cands.add(half)
        b_cands = sorted(cands, reverse=True)

    # d_blk: full D_out, else 256-aligned tiles (128 as last resort).
    if D_out <= 128:
        d_cands = [D_out]
    else:
        cands = {D_out}
        for v in (4096, 2048, 1024, 512, 256, 128):
            if v < D_out:
                cands.add(v)
        d_cands = sorted(cands, reverse=True)

    chosen = None
    # Pass 1: full proj-weight residency (d_blk == D_out, constant block index
    # -> the weight is DMA'd exactly once for the whole grid); within that, the
    # largest batch block that fits the budget.
    for b_blk in b_cands:
        t_chunk = pick_t_chunk(b_blk)
        if footprint(b_blk, D_out, t_chunk) <= budget:
            chosen = (b_blk, D_out, t_chunk)
            break
    # Pass 2: tiled weight.  Maximize b_blk first (proj_w is re-read once per
    # batch block in this grid order), then the largest d_blk that fits.
    if chosen is None:
        for b_blk in b_cands:
            t_chunk = pick_t_chunk(b_blk)
            for d_blk in d_cands:
                if d_blk == D_out:
                    continue  # already tried in pass 1
                if footprint(b_blk, d_blk, t_chunk) <= budget:
                    chosen = (b_blk, d_blk, t_chunk)
                    break
            if chosen is not None:
                break
    if chosen is None:
        # Smallest legal tiles; only reachable for extreme T*D_in.
        b_blk = b_cands[-1]
        d_blk = d_cands[-1]
        chosen = (b_blk, d_blk, pick_t_chunk(b_blk))

    b_blk, d_blk, t_chunk = chosen
    n_chunks = T // t_chunk
    grid = (pl.cdiv(B, b_blk), pl.cdiv(D_out, d_blk))

    # vmem_limit is a ceiling (with headroom over the computed footprint), not
    # a fitter: tile shrinkage above is what makes the working set fit.
    fp = footprint(b_blk, d_blk, t_chunk)
    hard_cap = max(budget, hw_cap - 4 * 1024 * 1024)
    vmem_limit = int(min(max(int(fp * 1.25), 32 * 1024 * 1024), hard_cap))

    kernel = functools.partial(_resampler_kernel, t_chunk=t_chunk, n_chunks=n_chunks)

    out = pl.pallas_call(
        kernel,
        out_shape=jax.ShapeDtypeStruct((B, D_out), x.dtype),
        grid_spec=pltpu.PrefetchScalarGridSpec(
            num_scalar_prefetch=0,
            grid=grid,
            in_specs=[
                pl.BlockSpec((T, D_in), lambda i, j: (0, 0)),            # softmaxed mix weights (resident)
                pl.BlockSpec((b_blk, T, D_in), lambda i, j: (i, 0, 0)),  # batch block (read once)
                pl.BlockSpec((D_in, d_blk), lambda i, j: (0, j)),        # pre-transposed weight tile
                pl.BlockSpec((1, d_blk), lambda i, j: (0, j)),           # bias tile
            ],
            out_specs=pl.BlockSpec((b_blk, d_blk), lambda i, j: (i, j)), # lane/sublane-dense store
            scratch_shapes=[pltpu.VMEM((b_blk, D_in), jnp.float32)],
        ),
        compiler_params=pltpu.CompilerParams(
            # Batch blocks are independent ("parallel"; sharded across v7x's two
            # TensorCores).  The D_out-tile axis must stay sequential
            # ("arbitrary") because the pooled scratch is written at j == 0 and
            # reused for j > 0.
            dimension_semantics=("parallel", "arbitrary"),
            vmem_limit_bytes=vmem_limit,
        ),
    )(sm, x, pw_t, pb)

    return out.reshape(B, 1, D_out)


def _reference(x, weight, proj_w, proj_b):
    w = jax.nn.softmax(weight.astype(jnp.float32), axis=0)
    mixed = jnp.sum(w[None] * x.astype(jnp.float32), axis=1, keepdims=True)
    proj = jnp.einsum("bsd,od->bso", mixed, proj_w.astype(jnp.float32),
                      precision=lax.Precision.HIGHEST)
    return proj + proj_b.astype(jnp.float32)


def _check(x, weight, proj_w, proj_b, atol=5e-3, rtol=5e-3):
    out = jax.block_until_ready(conv1d_resampler(x, weight, proj_w, proj_b))
    ref = _reference(x, weight, proj_w, proj_b)
    assert out.shape == (x.shape[0], 1, proj_w.shape[0]), out.shape
    err = jnp.max(jnp.abs(out.astype(jnp.float32) - ref))
    assert jnp.allclose(out.astype(jnp.float32), ref, atol=atol, rtol=rtol), err


if __name__ == "__main__":
    key = jax.random.PRNGKey(0)
    k_x, k_w, k_pw, k_pb, k_x2, k_x3, k_w3, k_pw3, k_pb3 = jax.random.split(key, 9)

    # Test 1: small shapes implied by the module (x is (batch, num_tokens, in_dim)).
    B, T, D_in, D_out = 2, 8, 128, 128
    x = jax.random.normal(k_x, (B, T, D_in), dtype=jnp.float32)
    weight = jax.random.normal(k_w, (T, D_in), dtype=jnp.float32)              # nn.Parameter(randn(T, D_in))
    proj_w = jax.random.normal(k_pw, (D_out, D_in), dtype=jnp.float32) * 0.05  # nn.Linear weight
    proj_b = jax.random.normal(k_pb, (D_out,), dtype=jnp.float32) * 0.05       # nn.Linear bias
    _check(x, weight, proj_w, proj_b)

    # Test 2: larger batch (exercises the batch-block grid / v7x split path).
    B2 = 16
    x2 = jax.random.normal(k_x2, (B2, T, D_in), dtype=jnp.float32)
    _check(x2, weight, proj_w, proj_b)

    # Test 3: longer token axis + wider dims (exercises the T-chunked pooling
    # accumulation and the D_out tile selection).
    B3, T3, D_in3, D_out3 = 16, 48, 512, 256
    x3 = jax.random.normal(k_x3, (B3, T3, D_in3), dtype=jnp.float32)
    weight3 = jax.random.normal(k_w3, (T3, D_in3), dtype=jnp.float32)
    proj_w3 = jax.random.normal(k_pw3, (D_out3, D_in3), dtype=jnp.float32) * 0.05
    proj_b3 = jax.random.normal(k_pb3, (D_out3,), dtype=jnp.float32) * 0.05
    _check(x3, weight3, proj_w3, proj_b3)

    print("KERNEL_OK")
</pallas_src>

<mosaic_0001>
module attributes {stable_mosaic.version = 11 : i64} {
  func.func @_resampler_kernel(%arg0: i32, %arg1: i32, %arg2: memref<8x128xf32, #tpu.memory_space<vmem>>, %arg3: memref<2x8x128xf32, #tpu.memory_space<vmem>>, %arg4: memref<128x128xf32, #tpu.memory_space<vmem>>, %arg5: memref<1x128xf32, #tpu.memory_space<vmem>>, %arg6: memref<2x128xf32, #tpu.memory_space<vmem>>, %arg7: memref<2x128xf32, #tpu.memory_space<vmem>>) attributes {dimension_semantics = [#tpu.dimension_semantics<parallel>, #tpu.dimension_semantics<arbitrary>], iteration_bounds = array<i64: 1, 1>, scalar_prefetch = 0 : i64, scratch_operands = 1 : i64, tpu.core_type = #tpu.core_type<tc>, window_params = [{pipeline_mode = #tpu.pipeline_mode<synchronous>, transform_indices = @transform_0, window_bounds = array<i64: 8, 128>}, {transform_indices = @transform_1, window_bounds = array<i64: 2, 8, 128>}, {transform_indices = @transform_2, window_bounds = array<i64: 128, 128>}, {transform_indices = @transform_3, window_bounds = array<i64: 1, 128>}, {transform_indices = @transform_4, window_bounds = array<i64: 2, 128>}]} {
    %c0_i32 = arith.constant 0 : i32
    %0 = arith.cmpi eq, %arg1, %c0_i32 : i32
    %1 = arith.extui %0 : i1 to i32
    %c0_i32_0 = arith.constant 0 : i32
    %2 = arith.cmpi ne, %1, %c0_i32_0 : i32
    scf.if %2 {
      %c0_8 = arith.constant 0 : index
      %c0_9 = arith.constant 0 : index
      %10 = vector.load %arg2[%c0_8, %c0_9] : memref<8x128xf32, #tpu.memory_space<vmem>>, vector<8x128xf32>
      %c0_10 = arith.constant 0 : index
      %c0_11 = arith.constant 0 : index
      %c0_12 = arith.constant 0 : index
      %11 = vector.load %arg3[%c0_10, %c0_11, %c0_12] : memref<2x8x128xf32, #tpu.memory_space<vmem>>, vector<2x8x128xf32>
      %12 = vector.shape_cast %10 : vector<8x128xf32> to vector<1x8x128xf32>
      %13 = vector.broadcast %12 : vector<1x8x128xf32> to vector<2x8x128xf32>
      %14 = arith.mulf %13, %11 : vector<2x8x128xf32>
      %cst_13 = arith.constant dense<0.000000e+00> : vector<2x128xf32>
      %15 = vector.multi_reduction <add>, %14, %cst_13 [1] : vector<2x8x128xf32> to vector<2x128xf32>
      %c0_14 = arith.constant 0 : index
      %c0_15 = arith.constant 0 : index
      %16 = vector.load %arg7[%c0_14, %c0_15] : memref<2x128xf32, #tpu.memory_space<vmem>>, vector<2x128xf32>
      tpu.vector_store %arg7[%c0_14, %c0_15], %15 {strides = array<i32>} : memref<2x128xf32, #tpu.memory_space<vmem>>, vector<2x128xf32>,
    } else {
    }
    %c0 = arith.constant 0 : index
    %c0_1 = arith.constant 0 : index
    %3 = vector.load %arg7[%c0, %c0_1] : memref<2x128xf32, #tpu.memory_space<vmem>>, vector<2x128xf32>
    %c0_2 = arith.constant 0 : index
    %c0_3 = arith.constant 0 : index
    %4 = vector.load %arg4[%c0_2, %c0_3] : memref<128x128xf32, #tpu.memory_space<vmem>>, vector<128x128xf32>
    %cst = arith.constant dense<0.000000e+00> : vector<2x128xf32>
    %5 = tpu.matmul %3, %4, %cst {dimension_numbers = #tpu.dot_dimension_numbers<[1], [0], [0], [1], [0, 0, 1, 1], [], []>} : vector<2x128xf32>, vector<128x128xf32>, vector<2x128xf32> -> vector<2x128xf32>
    %c0_4 = arith.constant 0 : index
    %c0_5 = arith.constant 0 : index
    %6 = vector.load %arg5[%c0_4, %c0_5] : memref<1x128xf32, #tpu.memory_space<vmem>>, vector<1x128xf32>
    %7 = vector.broadcast %6 : vector<1x128xf32> to vector<2x128xf32>
    %8 = arith.addf %5, %7 : vector<2x128xf32>
    %c0_6 = arith.constant 0 : index
    %c0_7 = arith.constant 0 : index
    %9 = vector.load %arg6[%c0_6, %c0_7] : memref<2x128xf32, #tpu.memory_space<vmem>>, vector<2x128xf32>
    tpu.vector_store %arg6[%c0_6, %c0_7], %8 {strides = array<i32>} : memref<2x128xf32, #tpu.memory_space<vmem>>, vector<2x128xf32>,
    return
  }
  func.func @transform_0(%arg0: i32, %arg1: i32) -> (i32, i32) {
    %c0_i32 = arith.constant 0 : i32
    %c0_i32_0 = arith.constant 0 : i32
    %c0_i32_1 = arith.constant 0 : i32
    return %c0_i32, %c0_i32_0 : i32, i32
  }
  func.func @transform_1(%arg0: i32, %arg1: i32) -> (i32, i32, i32) {
    %c0_i32 = arith.constant 0 : i32
    %c0_i32_0 = arith.constant 0 : i32
    %c0_i32_1 = arith.constant 0 : i32
    return %arg0, %c0_i32, %c0_i32_0 : i32, i32, i32
  }
  func.func @transform_2(%arg0: i32, %arg1: i32) -> (i32, i32) {
    %c0_i32 = arith.constant 0 : i32
    %c0_i32_0 = arith.constant 0 : i32
    return %c0_i32, %arg1 : i32, i32
  }
  func.func @transform_3(%arg0: i32, %arg1: i32) -> (i32, i32) {
    %c0_i32 = arith.constant 0 : i32
    %c0_i32_0 = arith.constant 0 : i32
    return %c0_i32, %arg1 : i32, i32
  }
  func.func @transform_4(%arg0: i32, %arg1: i32) -> (i32, i32) {
    %c0_i32 = arith.constant 0 : i32
    return %arg0, %arg1 : i32, i32
  }
}

</mosaic_0001>

<bundles_post_ra>
// kernel: tpu_custom_call.1
= control target key start
LH: loop header
LB: loop body
LE: loop exit
PB: predicated region body
PF: predicated region fallthrough
CT: control target
= control target key end

     0   :  { %9 = vsyncpa [#allocation4], 0  ;;  %s407_s0 = inlined_call_operand.hbm [shape: f32[8,128], index: 0, kind: input, shape index: {}]   ;;  %s408_s1 = inlined_call_operand.hbm [shape: f32[2,8,128], index: 1, kind: input, shape index: {}]   ;;  %s409_s2 = inlined_call_operand.hbm [shape: f32[128,128], index: 2, kind: input, shape index: {}]   ;;  %s410_s3 = inlined_call_operand.vmem [shape: f32[1,128], index: 3, kind: input, shape index: {}]   ;;  %s411_s4 = inlined_call_operand.hbm [shape: f32[2,128], index: 4, kind: output, shape index: {}]  }
   0x1   :  { %10 = vsyncpa [#allocation7], 0 }
   0x2   :  { %11 = vsyncpa [#allocation5], 0  ;;  %s342_s15 = smov [#allocation6]  }
   0x3   :  { %s27_s16 = sshll.u32 %s342_s15, 4  ;;  %s28_s16 = int_to_ptr.vmem [resolvable:$true] %s27_s16 }
   0x4   :  { %s264_s17 = scalar_lea.vmem %s28_s16, 256  ;;  %p269_p1 = scmp.lt.s32.totalorder %s28_s16, %s28_s16 }
   0x5   :  { %p265_p0 = scmp.ne.s32.totalorder %s28_s16, %s264_s17  ;;  %p270_p2 = scmp.lt.s32.totalorder %s264_s17, %s264_s17 }
   0x7   :  { %p271_p3 = por %p270_p2, %p269_p1 }
   0x9   :  { %p272_p4 = pnand %p271_p3, %p265_p0 }
   0xb   :  { %275 = shalt.err (!%p272_p4)
}
   0xc   :  { %s343_s18 = smov 128   ;;  %s344_s19 = smov 8  }
   0xd   :  { %33 = dma.hbm_to_vmem [thread:$0]  %s408_s1, 256, %s28_s16, [#allocation7], %s343_s18, %s343_s18, %s344_s19  }
   0xe   :  { %s345_s22 = smov [#allocation3]   ;;  %s346_s24 = smov [#allocation8]  }
   0xf   :  { %s18_s23 = sshll.u32 %s345_s22, 4  ;;  %s39_s25 = sshll.u32 %s346_s24, 4  ;;  %s19_s23 = int_to_ptr.vmem [resolvable:$true] %s18_s23  ;;  %s40_s25 = int_to_ptr.vmem [resolvable:$true] %s39_s25 }
  0x10   :  { %s284_s26 = scalar_lea.vmem %s19_s23, 128  ;;  %p289_p6 = scmp.lt.s32.totalorder %s19_s23, %s19_s23 }
  0x11   :  { %p285_p5 = scmp.ne.s32.totalorder %s19_s23, %s284_s26  ;;  %p290_p7 = scmp.lt.s32.totalorder %s284_s26, %s284_s26 }
  0x13   :  { %p291_p8 = por %p290_p7, %p289_p6 }
  0x15   :  { %p292_p9 = pnand %p291_p8, %p285_p5 }
  0x17   :  { %295 = shalt.err (!%p292_p9)
}
  0x18   :  { %21 = dma.hbm_to_vmem [thread:$0]  %s407_s0, 128, %s19_s23, [#allocation4]  }
  0x19   :  { %s304_s29 = scalar_lea.vmem %s40_s25, 2048  ;;  %p309_p11 = scmp.lt.s32.totalorder %s40_s25, %s40_s25 }
  0x1a   :  { %p305_p10 = scmp.ne.s32.totalorder %s40_s25, %s304_s29  ;;  %p310_p12 = scmp.lt.s32.totalorder %s304_s29, %s304_s29 }
  0x1c   :  { %p311_p13 = por %p310_p12, %p309_p11 }
  0x1e   :  { %p312_p0 = pnand %p311_p13, %p305_p10 }
  0x20   :  { %315 = shalt.err (!%p312_p0)
}
  0x21   :  { %45 = dma.hbm_to_vmem [thread:$0]  %s409_s2, 2048, %s40_s25, [#allocation7], %s343_s18, %s343_s18, %s344_s19  }
  0x22   :  { %336 = dma.done.wait [#allocation4], 128  }
  0x23   :  { %337 = vsyncadd [#allocation4], 4294967168 }
  0x24   :  { %338 = dma.done.wait [#allocation7], 2304  }
  0x25   :  { %339 = vsyncadd [#allocation7], 4294964992  ;;  %v347_v0 = vmov 0.0   ;;  %vm348_vm0 = vmmov 0   ;;  %v100_v1 = vld [vmem:[#allocation8 + $0x78] sm:$0xff]  ;;  %v99_v2 = vld [vmem:[#allocation8 + $0x70] sm:$0xff] }
  0x26   :  { %213 = vmatprep.subr.mxu0 %v347_v0  ;;  %245 = vmatprep.mubr.msk.f32.mxu0 %vm348_vm0, %v347_v0  ;;  %v98_v3 = vld [vmem:[#allocation8 + $0x68] sm:$0xff]  ;;  %v97_v4 = vld [vmem:[#allocation8 + $0x60] sm:$0xff]  ;;  %v62_v6 = vld [vmem:[#allocation6] sm:$0xff]  ;;  %vm80_vm1 = vcmask 1041409   ;;  %s349_s5 = smov [#allocation9]  }
  0x27   :  { %214 = vmatpush3.msra.mxu0 %v100_v1  ;;  %v61_v5 = vld [vmem:[#allocation3] sm:$0xff]  ;;  %v96_v7 = vld [vmem:[#allocation8 + $0x58] sm:$0xff]  ;;  %v95_v11 = vld [vmem:[#allocation8 + $0x50] sm:$0xff]  ;;  %s185_s6 = sshll.u32 %s349_s5, 4  ;;  %s186_s6 = int_to_ptr.vmem [resolvable:$true] %s185_s6 }
  0x28   :  { %215 = vmatprep.subr.mxu0 %v347_v0  ;;  %v63_v8 = vld [vmem:[#allocation6 + $0x8] sm:$0xff]  ;;  %v64_v9 = vmul.f32 %v62_v6, %v61_v5  ;;  %v94_v14 = vld [vmem:[#allocation8 + $0x48] sm:$0xff]  ;;  %v93_v17 = vld [vmem:[#allocation8 + $0x40] sm:$0xff]  ;;  %s316_s7 = scalar_lea.vmem %s186_s6, 32  ;;  %p321_p2 = scmp.lt.s32.totalorder %s186_s6, %s186_s6 }
  0x29   :  { %216 = vmatpush3.msra.mxu0 %v99_v2  ;;  %v65_v10 = vmul.f32 %v63_v8, %v61_v5  ;;  %v92_v20 = vld [vmem:[#allocation8 + $0x38] sm:$0xff]  ;;  %v91_v23 = vld [vmem:[#allocation8 + $0x30] sm:$0xff]  ;;  %v90_v26 = vld [vmem:[#allocation8 + $0x28] sm:$0xff]  ;;  %p317_p1 = scmp.ne.s32.totalorder %s186_s6, %s316_s7  ;;  %p322_p3 = scmp.lt.s32.totalorder %s316_s7, %s316_s7 }
  0x2a   :  { %217 = vmatprep.subr.mxu0 %v347_v0  ;;  %v66_v12 = vrot.slane %v64_v9, 4  ;;  %v89_v29 = vld [vmem:[#allocation8 + $0x20] sm:$0xff]  ;;  %v88_v31 = vld [vmem:[#allocation8 + $0x18] sm:$0xff]  ;;  %v87_v32 = vld [vmem:[#allocation8 + $0x10] sm:$0xff] }
  0x2b   :  { %218 = vmatpush3.msra.mxu0 %v98_v3  ;;  %v72_v13 = vrot.slane %v65_v10, 4  ;;  %v86_v33 = vld [vmem:[#allocation8 + $0x8] sm:$0xff]  ;;  %v85_v34 = vld [vmem:[#allocation8] sm:$0xff]  ;;  %p323_p4 = por %p322_p3, %p321_p2 }
  0x2c   :  { %219 = vmatprep.subr.mxu0 %v347_v0  ;;  %v67_v15 = vadd.f32 %v66_v12, %v64_v9  ;;  %v195_v36 = vld [vmem:[%s410_s3] ss:$0 sm:$0xff] }
  0x2d   :  { %220 = vmatpush3.msra.mxu0 %v97_v4  ;;  %v73_v16 = vadd.f32 %v72_v13, %v65_v10  ;;  %p324_p5 = pnand %p323_p4, %p317_p1 }
  0x2e   :  { %221 = vmatprep.subr.mxu0 %v347_v0  ;;  %v68_v18 = vrot.slane %v67_v15, 2 }
  0x2f   :  { %222 = vmatpush3.msra.mxu0 %v96_v7  ;;  %v74_v19 = vrot.slane %v73_v16, 2 }
  0x30   :  { %223 = vmatprep.subr.mxu0 %v347_v0  ;;  %v69_v21 = vadd.f32 %v68_v18, %v67_v15 }
  0x31   :  { %224 = vmatpush3.msra.mxu0 %v95_v11  ;;  %v75_v22 = vadd.f32 %v74_v19, %v73_v16 }
  0x32   :  { %225 = vmatprep.subr.mxu0 %v347_v0  ;;  %v70_v24 = vrot.slane %v69_v21, 1 }
  0x33   :  { %226 = vmatpush3.msra.mxu0 %v94_v14  ;;  %v76_v25 = vrot.slane %v75_v22, 1 }
  0x34   :  { %227 = vmatprep.subr.mxu0 %v347_v0  ;;  %v71_v27 = vadd.f32 %v70_v24, %v69_v21 }
  0x35   :  { %228 = vmatpush3.msra.mxu0 %v93_v17  ;;  %v77_v28 = vadd.f32 %v76_v25, %v75_v22 }
  0x36   :  { %229 = vmatprep.subr.mxu0 %v347_v0 }
  0x37   :  { %230 = vmatpush3.msra.mxu0 %v92_v20  ;;  %v81_v30 = vsel %vm80_vm1, %v77_v28, %v71_v27 }
  0x38   :  { %231 = vmatprep.subr.mxu0 %v347_v0  ;;  %83 = vst [vmem:[#allocation2] sm:$0x3] %v81_v30 }
  0x39   :  { %232 = vmatpush3.msra.mxu0 %v91_v23 }
  0x3a   :  { %233 = vmatprep.subr.mxu0 %v347_v0 }
  0x3b   :  { %234 = vmatpush3.msra.mxu0 %v90_v26 }
  0x3c   :  { %235 = vmatprep.subr.mxu0 %v347_v0 }
  0x3d   :  { %236 = vmatpush3.msra.mxu0 %v89_v29 }
  0x3e   :  { %237 = vmatprep.subr.mxu0 %v347_v0 }
  0x3f   :  { %238 = vmatpush3.msra.mxu0 %v88_v31  ;;  %v84_v35 = vld [vmem:[#allocation2] sm:$0x3] }
  0x40   :  { %239 = vmatprep.subr.mxu0 %v347_v0 }
  0x41   :  { %240 = vmatpush3.msra.mxu0 %v87_v32 }
  0x42   :  { %241 = vmatprep.subr.mxu0 %v347_v0 }
  0x43   :  { %242 = vmatpush3.msra.mxu0 %v86_v33 }
  0x44   :  { %243 = vmatprep.subr.mxu0 %v347_v0 }
  0x45   :  { %244 = vmatpush3.msra.mxu0 %v85_v34 }
  0x46   :  { %246 = vmatmul.mubr.f32.vlgmr.msra.gmra.mxu0 %v84_v35 }
 0x106   :  { %v174_v37 = vpop.f32.mrf.mxu0 }
 0x107   :  { %v175_v38 = vadd.f32 %v195_v36, %v174_v37 }
 0x108   :  { %v247_v39 = vpop.f32.mrf.mxu0 }
 0x109   :  { %178 = vst [vmem:[#allocation9] sm:$0x3] %v175_v38 }
 0x10a   :  { %327 = shalt.err (!%p324_p5)
}
 0x10b   :  { %188 = dma.vmem_to_hbm [thread:$0]  %s186_s6, 32, %s411_s4, [#allocation5]  }
 0x10c   :  { %340 = dma.done.wait [#allocation5], 32  }
 0x10d   :  { %341 = vsyncadd [#allocation5], 4294967264 }
 0x10e   :  { %192 = vsyncpa [#allocation4], 1 }
 0x10f   :  { %193 = vsyncpa [#allocation7], 1 }
 0x110   :  { %194 = vsyncpa [#allocation5], 1 }

</bundles_post_ra>
